<compile_context>
chip_gen: v6e
topology: v6e:2x2x1
jax: 0.10.0
libtpu: 0.0.40
codegen_flags: <defaults>
</compile_context>

<pallas_src>
import functools

import jax
import jax.numpy as jnp
from jax.experimental import pallas as pl
from jax.experimental.pallas import tpu as pltpu


_MASK_VALUE = -1e30  # finite "minus infinity": exp(mask - m) underflows to 0, no inf-inf NaNs


def _row_lse_kernel(f_ref, g_ref, lse_ref, col_plse_ref, m_ref, l_ref, *,
                    tile: int, n_valid: int, g_resident: bool,
                    needs_mask: bool, exp_dtype):
    """Grid = (i row tile ["parallel"], j col tile ["arbitrary" reduction]).

    Emits:
      lse_ref      (T, 1)     : logsumexp over ALL columns for the rows of tile i
                                (online accumulation across j via m_ref / l_ref scratch).
      col_plse_ref (1,1,1,T)  : partial column logsumexp over the rows of tile i only,
                                for the columns of tile j (combined across i in JAX).
    """
    i = pl.program_id(0)
    j = pl.program_id(1)
    n_j = pl.num_programs(1)

    # ---- per-row-tile init (start of every column sweep) ----------------------
    @pl.when(j == 0)
    def _():
        m_ref[...] = jnp.full(m_ref.shape, -jnp.inf, m_ref.dtype)
        l_ref[...] = jnp.zeros(l_ref.shape, l_ref.dtype)

    f = f_ref[...]                                       # (T, D), pre-scaled by 1/tau
    if g_resident:
        off = pl.multiple_of(j * tile, tile)
        g = g_ref[pl.ds(off, tile), :]                   # (T, D) slice of VMEM-resident g
    else:
        g = g_ref[...]                                   # (T, D) streamed column tile

    # Logits tile on the MXU (bf16 in, f32 accumulate); no g.T materialization.
    s = jax.lax.dot_general(f, g, (((1,), (1,)), ((), ())),
                            preferred_element_type=jnp.float32)          # (T, T) f32

    if needs_mask:
        row_ids = jax.lax.broadcasted_iota(jnp.int32, s.shape, 0) + i * tile
        col_ids = jax.lax.broadcasted_iota(jnp.int32, s.shape, 1) + j * tile
        s = jnp.where((row_ids < n_valid) & (col_ids < n_valid), s, _MASK_VALUE)

    ones_col = jnp.ones((tile, 1), exp_dtype)
    ones_row = jnp.ones((1, tile), exp_dtype)

    # ---- row direction (f -> g): online logsumexp across column tiles ---------
    m_old = m_ref[...]
    m_new = jnp.maximum(m_old, jnp.max(s, axis=1, keepdims=True))        # (T, 1)
    p_row = jnp.exp((s - m_new).astype(exp_dtype))                       # (T, T)
    row_sum = jax.lax.dot_general(p_row, ones_col, (((1,), (0,)), ((), ())),
                                  preferred_element_type=jnp.float32)    # (T, 1) on MXU
    l_ref[...] = l_ref[...] * jnp.exp(m_old - m_new) + row_sum
    m_ref[...] = m_new

    # ---- column direction (g -> f): per-(i, j) partial logsumexp --------------
    c_max = jnp.max(s, axis=0, keepdims=True)                            # (1, T)
    p_col = jnp.exp((s - c_max).astype(exp_dtype))                       # (T, T)
    col_sum = jax.lax.dot_general(ones_row, p_col, (((1,), (0,)), ((), ())),
                                  preferred_element_type=jnp.float32)    # (1, T) on MXU
    col_plse_ref[...] = (c_max + jnp.log(col_sum)).reshape(col_plse_ref.shape)

    # ---- finalize this row tile (all column tiles have been seen) -------------
    @pl.when(j == n_j - 1)
    def _():
        lse_ref[...] = m_ref[...] + jnp.log(l_ref[...])


def _round_up(x: int, m: int) -> int:
    return (x + m - 1) // m * m


def _device_kind() -> str:
    try:
        return jax.devices()[0].device_kind.lower()
    except Exception:
        return ""


def _is_v6_or_newer() -> bool:
    kind = _device_kind()
    return any(tag in kind for tag in ("v6", "v7", "7x"))


def _vmem_budget_bytes() -> int:
    try:
        cap = int(pltpu.get_tpu_info().vmem_capacity_bytes)
    except Exception:
        cap = 64 * 1024 * 1024          # v7x per-TensorCore VMEM (smallest of v5e/v6e/v7x)
    return max(int(cap * 0.65), 32 * 1024 * 1024)


def _plan(n: int, d: int, in_isz: int, budget: int):
    """Pick (tile, padded N, g-resident?) under a generation-aware VMEM budget."""
    n8 = _round_up(max(n, 8), 8)
    max_tile = 1024 if _is_v6_or_newer() else 256   # v5e roofline is already met at 256
    tile = 8
    for t in (1024, 512, 256, 128, 64, 32, 16, 8):
        if t > max_tile or t > n8:
            continue
        # double-buffered f tile + ~3 live (T,T) f32 intermediates + stats/output blocks
        foot = 2 * t * d * in_isz + 3 * t * t * 4 + 32 * t * 4
        if foot <= budget // 2:
            tile = t
            break
    tile = min(tile, n8)
    n_pad = _round_up(n, tile)
    # g fully VMEM-resident (single DMA) when it fits, conservatively counting 2 buffers.
    g_resident = 2 * n_pad * d * in_isz <= budget // 3
    return tile, n_pad, g_resident


def inter_domain_infonce_loss(f: jax.Array, g: jax.Array, tau: float = 0.1,
                              block_size=None, mxu_dtype=jnp.bfloat16,
                              g_resident=None) -> jax.Array:
    """Bidirectional InfoNCE loss between two [N, D] embedding batches (== PyTorch module)."""
    assert f.ndim == 2 and f.shape == g.shape, "f and g must both be [N, D]"
    n, d = f.shape
    inv_tau = 1.0 / float(tau)

    f32f = f.astype(jnp.float32)
    f32g = g.astype(jnp.float32)
    # Exact positives diag(L) = <f_i, g_i>/tau, shared by both directions (O(N*D), plain JAX).
    diag = jnp.sum(f32f * f32g, axis=-1) * inv_tau                        # (N,)

    in_dtype = jnp.dtype(mxu_dtype if mxu_dtype is not None else f.dtype)
    in_isz = in_dtype.itemsize
    budget = _vmem_budget_bytes()

    if block_size is None:
        tile, n_pad, auto_res = _plan(n, d, in_isz, budget)
    else:
        assert block_size % 8 == 0, "block_size must be a multiple of 8"
        tile = int(block_size)
        n_pad = _round_up(n, tile)
        auto_res = 2 * n_pad * d * in_isz <= budget // 3
    g_res = auto_res if g_resident is None else bool(g_resident)
    nb = n_pad // tile
    needs_mask = n_pad != n

    # bf16 MXU feed: fold 1/tau into f so the scale rides the (free) cast; casting in the
    # wrapper (not per-tile in the kernel) also halves f/g HBM + VMEM + double-buffer bytes.
    f_in = (f32f * inv_tau).astype(in_dtype)
    g_in = f32g.astype(in_dtype)
    if needs_mask:
        f_in = jnp.pad(f_in, ((0, n_pad - n), (0, 0)))
        g_in = jnp.pad(g_in, ((0, n_pad - n), (0, 0)))

    # bf16 exps only where the EUP/VPU has a bf16 path (v6e/v7x) and only on the bf16 path.
    exp_dtype = (jnp.bfloat16 if (in_dtype == jnp.dtype(jnp.bfloat16) and _is_v6_or_newer())
                 else jnp.float32)

    kernel = functools.partial(
        _row_lse_kernel, tile=tile, n_valid=n, g_resident=g_res,
        needs_mask=needs_mask, exp_dtype=exp_dtype)

    if g_res:
        # Constant index map => g is DMA'd into VMEM once and reused by every grid step.
        g_spec = pl.BlockSpec((n_pad, d), lambda i, j: (0, 0))
    else:
        # TODO(synk): pl.Buffered(3) here for the small-D, DMA-latency-bound regime.
        g_spec = pl.BlockSpec((tile, d), lambda i, j: (j, 0))

    g_traffic = n_pad * d * in_isz * (1 if g_res else nb)

    lse_rows, col_plse = pl.pallas_call(
        kernel,
        out_shape=(jax.ShapeDtypeStruct((n_pad, 1), jnp.float32),
                   jax.ShapeDtypeStruct((nb, nb, 1, tile), jnp.float32)),
        grid_spec=pltpu.PrefetchScalarGridSpec(
            num_scalar_prefetch=0,
            grid=(nb, nb),                                     # (row tiles, col tiles)
            in_specs=[
                pl.BlockSpec((tile, d), lambda i, j: (i, 0)),  # f row tile, resident over j
                g_spec,
            ],
            out_specs=[
                pl.BlockSpec((tile, 1), lambda i, j: (i, 0)),             # per-row LSE
                pl.BlockSpec((1, 1, 1, tile), lambda i, j: (i, j, 0, 0)),  # col partial LSE
            ],
            scratch_shapes=[pltpu.VMEM((tile, 1), jnp.float32),   # running row max
                            pltpu.VMEM((tile, 1), jnp.float32)],  # running row exp-sum
        ),
        compiler_params=pltpu.CompilerParams(
            # Row-tile axis is fully independent -> megacore-shardable on v7x;
            # column axis is the sequential online-LSE reduction.
            dimension_semantics=("parallel", "arbitrary"),
            vmem_limit_bytes=budget,
        ),
        cost_estimate=pl.CostEstimate(
            flops=2 * n_pad * n_pad * d + 4 * n_pad * n_pad,
            transcendentals=2 * n_pad * n_pad,
            bytes_accessed=n_pad * d * in_isz + g_traffic + 4 * (n_pad + nb * n_pad)),
    )(f_in, g_in)

    # Tiny cross-row-tile combine + means in plain JAX (O(N*N/T) and O(N)).
    lse_row = lse_rows[:n, 0]                                             # (N,)
    lse_col = jax.nn.logsumexp(col_plse.reshape(nb, n_pad), axis=0)[:n]   # (N,)
    return jnp.mean(lse_row - diag) + jnp.mean(lse_col - diag)


def _reference_loss(f, g, tau):
    # Numerically-stable evaluation of the exact PyTorch forward (raw exp overflows f32):
    #   mean(lse_row(L) - diag(L)) + mean(lse_col(L) - diag(L)),  L = f @ g.T / tau
    logits = (f.astype(jnp.float32) @ g.astype(jnp.float32).T) / tau
    dg = jnp.diag(logits)
    return (jnp.mean(jax.nn.logsumexp(logits, axis=1) - dg)
            + jnp.mean(jax.nn.logsumexp(logits, axis=0) - dg))


if __name__ == "__main__":
    TAU = 0.1   # training_config.tau

    key = jax.random.PRNGKey(0)
    kf, kg, kh, ki = jax.random.split(key, 4)

    # 1) Multi-tile 2x2 grid, default bf16 MXU path.
    f = jax.random.normal(kf, (64, 32), jnp.float32)
    g = jax.random.normal(kg, (64, 32), jnp.float32)
    ref = _reference_loss(f, g, TAU)
    loss = jax.block_until_ready(inter_domain_infonce_loss(f, g, tau=TAU, block_size=32))
    assert bool(jnp.isfinite(loss)), loss
    assert jnp.allclose(loss, ref, rtol=1e-2, atol=1e-1), (loss, ref)

    # 2) Same inputs on the exact f32 MXU path, tight tolerance.
    loss32 = jax.block_until_ready(
        inter_domain_infonce_loss(f, g, tau=TAU, block_size=32, mxu_dtype=jnp.float32))
    assert jnp.allclose(loss32, ref, rtol=2e-3, atol=1e-2), (loss32, ref)

    # 3) Streamed-g path (residency forced off) must match too.
    loss_stream = jax.block_until_ready(
        inter_domain_infonce_loss(f, g, tau=TAU, block_size=32, mxu_dtype=jnp.float32,
                                  g_resident=False))
    assert jnp.allclose(loss_stream, ref, rtol=2e-3, atol=1e-2), (loss_stream, ref)

    # 4) N not a tile multiple -> padded + masked path.
    f3 = jax.random.normal(kh, (50, 32), jnp.float32)
    g3 = jax.random.normal(ki, (50, 32), jnp.float32)
    ref3 = _reference_loss(f3, g3, TAU)
    loss3 = jax.block_until_ready(
        inter_domain_infonce_loss(f3, g3, tau=TAU, block_size=32, mxu_dtype=jnp.float32))
    assert jnp.allclose(loss3, ref3, rtol=2e-3, atol=1e-2), (loss3, ref3)

    # 5) Tiny N, fully automatic plan (single tile, VMEM-resident g).
    f4 = jax.random.normal(jax.random.PRNGKey(2), (8, 32), jnp.float32)
    g4 = jax.random.normal(jax.random.PRNGKey(3), (8, 32), jnp.float32)
    ref4 = _reference_loss(f4, g4, TAU)
    loss4 = jax.block_until_ready(inter_domain_infonce_loss(f4, g4, tau=TAU))
    assert jnp.allclose(loss4, ref4, rtol=1e-2, atol=1e-1), (loss4, ref4)

    print("KERNEL_OK")
</pallas_src>

<mosaic_0001>
module attributes {stable_mosaic.version = 11 : i64} {
  func.func @_row_lse_kernel(%arg0: i32, %arg1: i32, %arg2: memref<32x32xbf16, #tpu.memory_space<vmem>>, %arg3: memref<64x32xbf16, #tpu.memory_space<vmem>>, %arg4: memref<32x1xf32, #tpu.memory_space<vmem>>, %arg5: memref<1x1x1x32xf32, #tpu.memory_space<vmem>>, %arg6: memref<32x1xf32, #tpu.memory_space<vmem>>, %arg7: memref<32x1xf32, #tpu.memory_space<vmem>>) attributes {dimension_semantics = [#tpu.dimension_semantics<parallel>, #tpu.dimension_semantics<arbitrary>], iteration_bounds = array<i64: 2, 2>, scalar_prefetch = 0 : i64, scratch_operands = 2 : i64, tpu.core_type = #tpu.core_type<tc>, window_params = [{transform_indices = @transform_0, window_bounds = array<i64: 32, 32>}, {pipeline_mode = #tpu.pipeline_mode<synchronous>, transform_indices = @transform_1, window_bounds = array<i64: 64, 32>}, {transform_indices = @transform_2, window_bounds = array<i64: 32, 1>}, {transform_indices = @transform_3, window_bounds = array<i64: 1, 1, 1, 32>}]} {
    %c0_i32 = arith.constant 0 : i32
    %0 = arith.cmpi eq, %arg1, %c0_i32 : i32
    %1 = arith.extui %0 : i1 to i32
    %c0_i32_0 = arith.constant 0 : i32
    %2 = arith.cmpi ne, %1, %c0_i32_0 : i32
    scf.if %2 {
      %cst_22 = arith.constant 0xFF800000 : f32
      %39 = vector.broadcast %cst_22 : f32 to vector<32x1xf32>
      %c0_23 = arith.constant 0 : index
      %c0_24 = arith.constant 0 : index
      %40 = vector.load %arg6[%c0_23, %c0_24] : memref<32x1xf32, #tpu.memory_space<vmem>>, vector<32x1xf32>
      tpu.vector_store %arg6[%c0_23, %c0_24], %39 {strides = array<i32>} : memref<32x1xf32, #tpu.memory_space<vmem>>, vector<32x1xf32>,
      %cst_25 = arith.constant 0.000000e+00 : f32
      %41 = vector.broadcast %cst_25 : f32 to vector<32x1xf32>
      %c0_26 = arith.constant 0 : index
      %c0_27 = arith.constant 0 : index
      %42 = vector.load %arg7[%c0_26, %c0_27] : memref<32x1xf32, #tpu.memory_space<vmem>>, vector<32x1xf32>
      tpu.vector_store %arg7[%c0_26, %c0_27], %41 {strides = array<i32>} : memref<32x1xf32, #tpu.memory_space<vmem>>, vector<32x1xf32>,
    } else {
    }
    %c0 = arith.constant 0 : index
    %c0_1 = arith.constant 0 : index
    %3 = vector.load %arg2[%c0, %c0_1] : memref<32x32xbf16, #tpu.memory_space<vmem>>, vector<32x32xbf16>
    %c32_i32 = arith.constant 32 : i32
    %4 = arith.muli %arg1, %c32_i32 : i32
    %5 = tpu.assume_multiple %4, 32 : i32
    %6 = arith.index_cast %5 : i32 to index
    %c0_2 = arith.constant 0 : index
    %7 = vector.load %arg3[%6, %c0_2] : memref<64x32xbf16, #tpu.memory_space<vmem>>, vector<32x32xbf16>
    %cst = arith.constant dense<0.000000e+00> : vector<32x32xf32>
    %8 = tpu.matmul %3, %7, %cst {dimension_numbers = #tpu.dot_dimension_numbers<[1], [1], [0], [0], [0, 0, 1, 0], [], []>} : vector<32x32xbf16>, vector<32x32xbf16>, vector<32x32xf32> -> vector<32x32xf32>
    %cst_3 = arith.constant 1.000000e+00 : f32
    %9 = vector.broadcast %cst_3 : f32 to vector<32x1xf32>
    %cst_4 = arith.constant 1.000000e+00 : f32
    %10 = vector.broadcast %cst_4 : f32 to vector<1x32xf32>
    %c0_5 = arith.constant 0 : index
    %c0_6 = arith.constant 0 : index
    %11 = vector.load %arg6[%c0_5, %c0_6] : memref<32x1xf32, #tpu.memory_space<vmem>>, vector<32x1xf32>
    %cst_7 = arith.constant dense<0xFF800000> : vector<32xf32>
    %12 = vector.multi_reduction <maximumf>, %8, %cst_7 [1] : vector<32x32xf32> to vector<32xf32>
    %13 = vector.shape_cast %12 : vector<32xf32> to vector<32x1xf32>
    %14 = arith.maximumf %11, %13 : vector<32x1xf32>
    %15 = vector.broadcast %14 : vector<32x1xf32> to vector<32x32xf32>
    %16 = arith.subf %8, %15 : vector<32x32xf32>
    %17 = math.exp %16 : vector<32x32xf32>
    %cst_8 = arith.constant dense<0.000000e+00> : vector<32x1xf32>
    %18 = tpu.matmul %17, %9, %cst_8 {dimension_numbers = #tpu.dot_dimension_numbers<[1], [0], [0], [1], [0, 0, 1, 1], [], []>} : vector<32x32xf32>, vector<32x1xf32>, vector<32x1xf32> -> vector<32x1xf32>
    %c0_9 = arith.constant 0 : index
    %c0_10 = arith.constant 0 : index
    %19 = vector.load %arg7[%c0_9, %c0_10] : memref<32x1xf32, #tpu.memory_space<vmem>>, vector<32x1xf32>
    %20 = arith.subf %11, %14 : vector<32x1xf32>
    %21 = math.exp %20 : vector<32x1xf32>
    %22 = arith.mulf %19, %21 : vector<32x1xf32>
    %23 = arith.addf %22, %18 : vector<32x1xf32>
    %c0_11 = arith.constant 0 : index
    %c0_12 = arith.constant 0 : index
    %24 = vector.load %arg7[%c0_11, %c0_12] : memref<32x1xf32, #tpu.memory_space<vmem>>, vector<32x1xf32>
    tpu.vector_store %arg7[%c0_11, %c0_12], %23 {strides = array<i32>} : memref<32x1xf32, #tpu.memory_space<vmem>>, vector<32x1xf32>,
    %c0_13 = arith.constant 0 : index
    %c0_14 = arith.constant 0 : index
    %25 = vector.load %arg6[%c0_13, %c0_14] : memref<32x1xf32, #tpu.memory_space<vmem>>, vector<32x1xf32>
    tpu.vector_store %arg6[%c0_13, %c0_14], %14 {strides = array<i32>} : memref<32x1xf32, #tpu.memory_space<vmem>>, vector<32x1xf32>,
    %cst_15 = arith.constant dense<0xFF800000> : vector<32xf32>
    %26 = vector.multi_reduction <maximumf>, %8, %cst_15 [0] : vector<32x32xf32> to vector<32xf32>
    %27 = vector.shape_cast %26 : vector<32xf32> to vector<1x32xf32>
    %28 = vector.broadcast %27 : vector<1x32xf32> to vector<32x32xf32>
    %29 = arith.subf %8, %28 : vector<32x32xf32>
    %30 = math.exp %29 : vector<32x32xf32>
    %cst_16 = arith.constant dense<0.000000e+00> : vector<1x32xf32>
    %31 = tpu.matmul %10, %30, %cst_16 {dimension_numbers = #tpu.dot_dimension_numbers<[1], [0], [0], [1], [0, 0, 1, 1], [], []>} : vector<1x32xf32>, vector<32x32xf32>, vector<1x32xf32> -> vector<1x32xf32>
    %32 = math.log %31 : vector<1x32xf32>
    %33 = arith.addf %27, %32 : vector<1x32xf32>
    %34 = vector.shape_cast %33 : vector<1x32xf32> to vector<1x1x1x32xf32>
    %c0_17 = arith.constant 0 : index
    %c0_18 = arith.constant 0 : index
    %c0_19 = arith.constant 0 : index
    %c0_20 = arith.constant 0 : index
    %35 = vector.load %arg5[%c0_17, %c0_18, %c0_19, %c0_20] : memref<1x1x1x32xf32, #tpu.memory_space<vmem>>, vector<1x1x1x32xf32>
    tpu.vector_store %arg5[%c0_17, %c0_18, %c0_19, %c0_20], %34 {strides = array<i32>} : memref<1x1x1x32xf32, #tpu.memory_space<vmem>>, vector<1x1x1x32xf32>,
    %c1_i32 = arith.constant 1 : i32
    %36 = arith.cmpi eq, %arg1, %c1_i32 : i32
    %37 = arith.extui %36 : i1 to i32
    %c0_i32_21 = arith.constant 0 : i32
    %38 = arith.cmpi ne, %37, %c0_i32_21 : i32
    scf.if %38 {
      %c0_22 = arith.constant 0 : index
      %c0_23 = arith.constant 0 : index
      %39 = vector.load %arg6[%c0_22, %c0_23] : memref<32x1xf32, #tpu.memory_space<vmem>>, vector<32x1xf32>
      %c0_24 = arith.constant 0 : index
      %c0_25 = arith.constant 0 : index
      %40 = vector.load %arg7[%c0_24, %c0_25] : memref<32x1xf32, #tpu.memory_space<vmem>>, vector<32x1xf32>
      %41 = math.log %40 : vector<32x1xf32>
      %42 = arith.addf %39, %41 : vector<32x1xf32>
      %c0_26 = arith.constant 0 : index
      %c0_27 = arith.constant 0 : index
      %43 = vector.load %arg4[%c0_26, %c0_27] : memref<32x1xf32, #tpu.memory_space<vmem>>, vector<32x1xf32>
      tpu.vector_store %arg4[%c0_26, %c0_27], %42 {strides = array<i32>} : memref<32x1xf32, #tpu.memory_space<vmem>>, vector<32x1xf32>,
    } else {
    }
    return
  }
  func.func @transform_0(%arg0: i32, %arg1: i32) -> (i32, i32) {
    %c0_i32 = arith.constant 0 : i32
    %c0_i32_0 = arith.constant 0 : i32
    return %arg0, %c0_i32 : i32, i32
  }
  func.func @transform_1(%arg0: i32, %arg1: i32) -> (i32, i32) {
    %c0_i32 = arith.constant 0 : i32
    %c0_i32_0 = arith.constant 0 : i32
    %c0_i32_1 = arith.constant 0 : i32
    return %c0_i32, %c0_i32_0 : i32, i32
  }
  func.func @transform_2(%arg0: i32, %arg1: i32) -> (i32, i32) {
    %c0_i32 = arith.constant 0 : i32
    %c0_i32_0 = arith.constant 0 : i32
    return %arg0, %c0_i32 : i32, i32
  }
  func.func @transform_3(%arg0: i32, %arg1: i32) -> (i32, i32, i32, i32) {
    %c0_i32 = arith.constant 0 : i32
    %c0_i32_0 = arith.constant 0 : i32
    %c0_i32_1 = arith.constant 0 : i32
    return %arg0, %arg1, %c0_i32, %c0_i32_0 : i32, i32, i32, i32
  }
}

</mosaic_0001>

<bundles_post_ra>
// kernel: tpu_custom_call.1
= control target key start
LH: loop header
LB: loop body
LE: loop exit
PB: predicated region body
PF: predicated region fallthrough
CT: control target
= control target key end

     0   :  { %9 = vsyncpa [#allocation5], 0  ;;  %s1312_s0 = inlined_call_operand.vmem [shape: bf16[64,32], index: 0, kind: input, shape index: {}]   ;;  %s1313_s1 = inlined_call_operand.vmem [shape: bf16[64,32], index: 1, kind: input, shape index: {}]   ;;  %s1314_s2 = inlined_call_operand.vmem [shape: f32[64,1], index: 2, kind: output, shape index: {0}]   ;;  %s1315_s3 = inlined_call_operand.hbm [shape: f32[2,2,1,32], index: 3, kind: output, shape index: {1}]  }
   0x1   :  { %11 = vsyncpa [#allocation5 + $0x1], 0  ;;  %s1053_s12 = smov 0   ;;  %s1055_s13 = smov 0  }
   0x2   :  { %s1057_s14 = smov 0   ;;  %s1059_s15 = smov 0  }
   0x3   :  { %s1061_s16 = smov 0   ;;  %s1063_s17 = smov 0  }
   0x4   :  { %s1065_s18 = smov 0   ;;  %s1067_s19 = smov 0  }
   0x5 LB: > { %s735_s20 = sadd.s32 4294967295, %s1024_s19   ;;  %s736_s21 = sadd.s32 4294967294, %s1024_s19   ;;  %s1024_s19 = sphi %s1067_s19, %s17_s19   ;;  %s1020_s18 = sphi %s1065_s18, %s1324_s18   ;;  %s1016_s17 = sphi %s1063_s17, %s1323_s17   ;;  %s1012_s16 = sphi %s1061_s16, %s1322_s16   ;;  %s1008_s15 = sphi %s1059_s15, %s1321_s15   ;;  %s1004_s14 = sphi %s1057_s14, %s1320_s14   ;;  %s1000_s13 = sphi %s1055_s13, %s1319_s13   ;;  %s996_s12 = sphi %s1053_s12, %s1318_s12  }
   0x6   : > { %s26_s22 = sadd.s32 1, %s1016_s17  ;;  %s29_s23 = sadd.s32 1, %s1020_s18 }
   0x7   : > { %p27_p0 = scmp.ge.s32.totalorder %s26_s22, 2  ;;  %p121_p1 = scmp.ne.s32.totalorder %s1004_s14, %s1000_s13 }
   0x8   : > { %p122_p2 = scmp.eq.s32.totalorder %s735_s20, 3  ;;  %p127_p5 = scmp.ne.s32.totalorder %s1000_s13, %s996_s12 }
   0x9   : > { %s1326_s22 = smov (%p27_p0, %s26_s22), 0  ;;  %s1328_s23 = smov (!%p27_p0, %s29_s23), %s1020_s18 }
   0xa   : > { %s107_s24 = ssub.s32 %s1016_s17, %s1326_s22  ;;  %p1104_p3 = por %p122_p2, %p121_p1 }
   0xb   : > { %p31_p4 = scmp.ge.s32.totalorder %s1328_s23, 2  ;;  %p128_p6 = scmp.eq.s32.totalorder %s736_s21, 3 }
   0xc   : > { %p739_p7 = scmp.ge.s32.totalorder %s1024_s19, 1  ;;  %p158_p9 = scmp.lt.s32.totalorder %s1024_s19, 5 }
   0xd   : > { %s1330_s23 = smov (%p31_p4, %s1328_s23), 0  ;;  %p1113_p8 = por %p128_p6, %p127_p5 }
   0xe   : > { %s106_s27 = ssub.s32 %s1020_s18, %s1330_s23  ;;  %s111_s28 = sadd.s32 1, %s1004_s14 }
   0xf   : > { %s108_s29 = sor.u32 %s107_s24, %s106_s27  ;;  %p159_p10 = pnand %p739_p7, %p158_p9 }
  0x10   : > { %p109_p11 = scmp.eq.s32.totalorder %s108_s29, 0  ;;  %s184_s4 = sand.u32 (!%p159_p10), 1, %s1000_s13  }
  0x11   : > { %162 = sbr.rel (%p159_p10) target bundleno = 803 (0x323), region = 28  ;;  %s740_s5 = sshll.u32 (!%p159_p10), %s1012_s16, 2 }
  0x12   : > { %s1122_s30 = scalar_select %p109_p11, %s1004_s14, %s111_s28  }
  0x13   : > { %p187_p12 = scmp.lt.s32.totalorder (!%p159_p10), %s740_s5, 7  ;;  %s1138_s24 = scalar_lea.vmem (!%p159_p10), [#allocation4], %s184_s4 }
  0x14   : > { %p744_p13 = scmp.ne.s32.totalorder (!%p159_p10), %s1008_s15, 0 }
  0x16   : > { %s1332_s5 = smov (!%p187_p12, %s740_s5), 7  ;;  %202 = sbr.rel (%p744_p13) target bundleno = 32 (0x20), region = 32 }
  0x17   : > { %s741_s6 = sshll.u32 %s1332_s5, 2  ;;  %s743_s7 = sshll.u32 %s1332_s5, 3 }
  0x18   : > { %s1129_s10 = scalar_lea.vmem %s1312_s0, %s741_s6  ;;  %s1134_s21 = scalar_lea.vmem %s1314_s2, %s743_s7 }
  0x1b   : > { %vm203_vm0 = vcmask 7168   ;;  %v1026_v0 = vmov -inf   ;;  %v1027_v1 = vmov 0.0  }
  0x1c   : > { %204 = vst.msk [vmem:[#allocation2] sm:$0xff] %vm203_vm0, %v1026_v0  ;;  %205 = vst.msk [vmem:[#allocation2 + $0x8] sm:$0xff] %vm203_vm0, %v1026_v0 }
  0x1d   : > { %206 = vst.msk [vmem:[#allocation2 + $0x10] sm:$0xff] %vm203_vm0, %v1026_v0  ;;  %207 = vst.msk [vmem:[#allocation2 + $0x18] sm:$0xff] %vm203_vm0, %v1026_v0 }
  0x1e   : > { %208 = vst.msk [vmem:[#allocation3] sm:$0xff] %vm203_vm0, %v1027_v1  ;;  %209 = vst.msk [vmem:[#allocation3 + $0x8] sm:$0xff] %vm203_vm0, %v1027_v1 }
  0x1f   : > { %210 = vst.msk [vmem:[#allocation3 + $0x10] sm:$0xff] %vm203_vm0, %v1027_v1  ;;  %211 = vst.msk [vmem:[#allocation3 + $0x18] sm:$0xff] %vm203_vm0, %v1027_v1 }
  0x20 PF: > { %s745_s27 = sshll.u32 %s1008_s15, 5  ;;  %v896_v2 = vld [vmem:[%s1129_s10] sm:$0xff]   ;;  %vm245_vm1 = vcmask 261120   ;;  %v897_v7 = vld [vmem:[%s1129_s10 + $0x8] sm:$0xff]   ;;  %v1028_v19 = vmov 0   ;;  %vm480_vm2 = vcmask 7168  }
  0x21   : > { %s217_s28 = sshra.s32 %s745_s27, 3  ;;  %784 = vmatprep.mubr.msk.bf16.mxu0 %vm245_vm1, %v896_v2  ;;  %893 = vset.pattern.permute.xlu1 %v1028_v19  ;;  %v1029_v36 = vmov 1.0   ;;  %v1030_v37 = vmov 0.0   ;;  %vm1031_vm3 = vmmov 0   ;;  %vm586_vm4 = vcmask 253952   ;;  %p758_p0 = scmp.ne.s32.totalorder %s1008_s15, 1 }
  0x22   : > { %s746_s29 = sshll.u32 %s217_s28, 2  ;;  %892 = vset.pattern.permute.xlu0 %v1028_v19  ;;  %788 = vmatprep.subr.mxu1 %v1029_v36 }
  0x23   : > { %s220_s7 = scalar_lea.vmem %s1313_s1, %s746_s29  ;;  %v1171_v22 = vld [vmem:[#allocation2] sm:$0xff]  ;;  %v1186_v29 = vld [vmem:[#allocation2 + $0x8] sm:$0xff]  ;;  %789 = vmatpush3.msra.mxu1 %v1029_v36 }
  0x24   : > { %v894_v3 = vld [vmem:[%s220_s7 + $0x8] sm:$0xff]   ;;  %v895_v4 = vld [vmem:[%s220_s7] sm:$0xff]   ;;  %v1169_v20 = vld [vmem:[#allocation2 + $0x10] sm:$0xff]  ;;  %790 = vmatprep.subr.mxu1 %v1029_v36 }
  0x25   : > { %813 = vmatprep.subr.msk.bf16.mxu0 %vm245_vm1, %v894_v3  ;;  %v256_v5 = vsel %vm245_vm1, %v894_v3, 0  ;;  %v253_v6 = vsel %vm245_vm1, %v895_v4, 0  ;;  %v1176_v25 = vld [vmem:[#allocation2 + $0x18] sm:$0xff]  ;;  %791 = vmatpush3.msra.mxu1 %v1029_v36 }
  0x26   : > { %781 = vmatpush3.bf16.xpose.msra.mxu0 %v256_v5  ;;  %792 = vmatprep.subr.mxu1 %v1029_v36  ;;  %v459_v19 = vld [vmem:[#allocation3 + $0x18] sm:$0xff] }
  0x27   : > { %814 = vmatprep.subr.msk.bf16.mxu0 %vm245_vm1, %v895_v4  ;;  %793 = vmatpush3.msra.mxu1 %v1029_v36 }
  0x28   : > { %794 = vmatprep.subr.mxu1 %v1029_v36 }
  0x29   : > { %795 = vmatpush3.msra.mxu1 %v1029_v36 }
  0x2a   : > { %802 = vmatprep.subr.mxu1 %v1030_v37 }
  0x2e   : > { %783 = vmatpush3.bf16.xpose.msra.mxu0 %v253_v6 }
  0x35   : > { %785 = vmatmul.mubr.msk.bf16.vlgmr.msra.gmra.mxu0 %vm245_vm1, %v897_v7 }
  0xf5   : > { %v1153_v8 = vpop.f32.mrf.mxu0 }
  0xf6   : > { %v317_v9 = vsel %vm245_vm1, %v1153_v8, -inf }
  0xf7   : > { %318 = vmax.xlane.f32.xlu1 %v317_v9  ;;  %v1157_v10 = vpop.f32.mrf.mxu0 }
  0xf8   : > { %v311_v11 = vsel %vm245_vm1, %v1157_v10, -inf }
  0xf9   : > { %312 = vmax.xlane.f32.xlu0 %v311_v11  ;;  %v1161_v12 = vpop.f32.mrf.mxu0 }
  0xfa   : > { %v320_v13 = vsel %vm245_vm1, %v1161_v12, -inf }
  0xfb   : > { %321 = vmax.xlane.f32.xlu1 %v320_v13  ;;  %v490_v14 = vmax.f32 %v317_v9, %v320_v13  ;;  %v1165_v15 = vpop.f32.mrf.mxu0  ;;  %v457_v13 = vld [vmem:[#allocation3 + $0x8] sm:$0xff] }
  0xfc   : > { %v314_v16 = vsel %vm245_vm1, %v1165_v15, -inf }
  0xfd   : > { %315 = vmax.xlane.f32.xlu0 %v314_v16  ;;  %v489_v17 = vmax.f32 %v311_v11, %v314_v16 }
  0xff   : > { %v491_v18 = vmax.f32 %v489_v17, %v490_v14 }
 0x101   : > { %v492_v38 = vrot.slane %v491_v18, 4 }
 0x103   : > { %v493_v39 = vmax.f32 %v491_v18, %v492_v38 }
 0x105   : > { %v494_v40 = vrot.slane %v493_v39, 2 }
 0x107   : > { %v495_v41 = vmax.f32 %v493_v39, %v494_v40 }
 0x109   : > { %v496_v42 = vrot.slane %v495_v41, 1 }
 0x10b   : > { %v1217_v43 = vmax.f32 %v495_v41, %v496_v42 }
 0x10d   : > { %v501_v45 = vsub.f32 %v1161_v12, %v1217_v43  ;;  %v500_v50 = vsub.f32 %v1153_v8, %v1217_v43  ;;  %v499_v54 = vsub.f32 %v1165_v15, %v1217_v43  ;;  %v498_v57 = vsub.f32 %v1157_v10, %v1217_v43 }
 0x10f   : > { %v508_v51 = vmul.f32 1.442695, %v501_v45  ;;  %v506_v58 = vmul.f32 1.442695, %v500_v50  ;;  %v504_v61 = vmul.f32 1.442695, %v499_v54 }
 0x110   : > { %v502_v63 = vmul.f32 1.442695, %v498_v57 }
 0x180   : > { %v319_v21 = vpop.xlane.xlu1 %318 }
 0x181   : > { %v1174_v23 = vmax.f32 %v1169_v20, %v319_v21 }
 0x182   : > { %v313_v24 = vpop.xlane.xlu0 %312 }
 0x183   : > { %v462_v26 = vsub.f32 %v1169_v20, %v1174_v23  ;;  %487 = vst.msk [vmem:[#allocation2 + $0x10] sm:$0xff] %vm480_vm2, %v1174_v23  ;;  %v1183_v27 = vmax.f32 %v1171_v22, %v313_v24  ;;  %339 = vperm.xlu1 %893, %v1174_v23  }
 0x184   : > { %v322_v28 = vpop.xlane.xlu1 %321 }
 0x185   : > { %v460_v30 = vsub.f32 %v1171_v22, %v1183_v27  ;;  %485 = vst.msk [vmem:[#allocation2] sm:$0xff] %vm480_vm2, %v1183_v27  ;;  %v1193_v31 = vmax.f32 %v1176_v25, %v322_v28  ;;  %329 = vperm.xlu0 %892, %v1183_v27   ;;  %v468_v11 = vmul.f32 1.442695, %v462_v26  ;;  %v458_v27 = vld [vmem:[#allocation3 + $0x10] sm:$0xff] }
 0x186   : > { %v316_v32 = vpop.xlane.xlu0 %315 }
 0x187   : > { %v463_v33 = vsub.f32 %v1176_v25, %v1193_v31  ;;  %488 = vst.msk [vmem:[#allocation2 + $0x18] sm:$0xff] %vm480_vm2, %v1193_v31  ;;  %v1201_v34 = vmax.f32 %v1186_v29, %v316_v32  ;;  %v464_v9 = vmul.f32 1.442695, %v460_v30 }
 0x189   : > { %v461_v35 = vsub.f32 %v1186_v29, %v1201_v34  ;;  %486 = vst.msk [vmem:[#allocation2 + $0x8] sm:$0xff] %vm480_vm2, %v1201_v34  ;;  %334 = vperm.xlu1 %893, %v1201_v34  }
 0x18d   : > { %344 = vperm.xlu1 %893, %v1193_v31  }
 0x1fe   : > { %v340_v44 = vpop.permute.xlu1 %339 }
 0x1ff   : > { %v349_v48 = vsub.f32 %v1153_v8, %v340_v44  ;;  %v466_v8 = vmul.f32 1.442695, %v461_v35 }
 0x200   : > { %v330_v46 = vpop.permute.xlu0 %329 }
 0x201   : > { %v347_v47 = vsub.f32 %v1157_v10, %v330_v46  ;;  %v355_v55 = vmul.f32 1.442695, %v349_v48  ;;  %v470_v10 = vmul.f32 1.442695, %v463_v33 }
 0x203   : > { %v351_v49 = vmul.f32 1.442695, %v347_v47 }
 0x204   : > { %v335_v52 = vpop.permute.xlu1 %334 }
 0x205   : > { %898 = vpow2.f32 %v351_v49  ;;  %v348_v53 = vsub.f32 %v1165_v15, %v335_v52  ;;  %v456_v15 = vld [vmem:[#allocation3] sm:$0xff] }
 0x206   : > { %900 = vpow2.f32 %v508_v51 }
 0x207   : > { %v353_v56 = vmul.f32 1.442695, %v348_v53 }
 0x208   : > { %v345_v59 = vpop.permute.xlu1 %344 }
 0x209   : > { %902 = vpow2.f32 %v353_v56  ;;  %v350_v60 = vsub.f32 %v1161_v12, %v345_v59 }
 0x20a   : > { %904 = vpow2.f32 %v355_v55 }
 0x20b   : > { %v357_v62 = vmul.f32 1.442695, %v350_v60  ;;  %906 = vpow2.f32 %v506_v58 }
 0x20d   : > { %908 = vpow2.f32 %v357_v62 }
 0x20e   : > { %910 = vpow2.f32 %v504_v61 }
 0x20f   : > { %912 = vpow2.f32 %v502_v63 }
 0x210   : > { %914 = vpow2.f32 %v466_v8 }
 0x211   : > { %916 = vpow2.f32 %v464_v9 }
 0x212   : > { %v899_v0 = vpop.eup %898  ;;  %918 = vpow2.f32 %v470_v10 }
 0x213   : > { %796 = vmatprep.mubr.msk.f32.mxu1 %vm245_vm1, %v899_v0  ;;  %v901_v1 = vpop.eup %900  ;;  %920 = vpow2.f32 %v468_v11 }
 0x216   : > { %v903_v2 = vpop.eup %902 }
 0x217   : > { %v905_v3 = vpop.eup %904  ;;  %797 = vmatmul.mubr.msk.f32.vlgmr.msra.gmra.mxu1 %vm245_vm1, %v903_v2 }
 0x218   : > { %803 = vmatpush3.msra.mxu1 %v901_v1  ;;  %799 = vmatprep.mubr.msk.f32.mxu1 %vm245_vm1, %v905_v3  ;;  %v907_v4 = vpop.eup %906 }
 0x219   : > { %804 = vmatprep.subr.mxu1 %v1030_v37 }
 0x21a   : > { %v909_v5 = vpop.eup %908  ;;  %805 = vmatpush3.msra.mxu1 %v907_v4 }
 0x21b   : > { %v911_v6 = vpop.eup %910  ;;  %806 = vmatprep.subr.mxu1 %v1030_v37  ;;  %800 = vmatmul.mubr.msk.f32.gmra.mxu1 %vm245_vm1, %v909_v5 }
 0x21c   : > { %807 = vmatpush3.msra.mxu1 %v911_v6  ;;  %810 = vmatprep.mubr.msk.f32.mxu1 %vm1031_vm3, %v1030_v37  ;;  %v913_v7 = vpop.eup %912 }
 0x21d   : > { %808 = vmatprep.subr.mxu1 %v1030_v37  ;;  %v915_v12 = vpop.eup %914 }
 0x21e   : > { %809 = vmatpush3.msra.mxu1 %v913_v7  ;;  %v917_v14 = vpop.eup %916  ;;  %v473_v16 = vmul.f32 %v915_v12, %v457_v13 }
 0x21f   : > { %811 = vmatmul.mubr.msk.f32.vlgmr.msra.gmra.mxu1 %vm245_vm1, %v1029_v36  ;;  %v919_v17 = vpop.eup %918  ;;  %v472_v22 = vmul.f32 %v917_v14, %v456_v15 }
 0x220   : > { %v921_v24 = vpop.eup %920  ;;  %v475_v23 = vmul.f32 %v919_v17, %v459_v19 }
 0x221   : > { %v474_v29 = vmul.f32 %v921_v24, %v458_v27 }
 0x2d7   : > { %v798_v18 = vpop.f32.mrf.mxu1 }
 0x2d8   : > { %v477_v21 = vadd.f32 %v798_v18, %v473_v16 }
 0x2d9   : > { %v437_v25 = vpop.f32.mrf.mxu1 }
 0x2da   : > { %482 = vst.msk [vmem:[#allocation3 + $0x8] sm:$0xff] %vm480_vm2, %v477_v21  ;;  %v476_v20 = vadd.f32 %v472_v22, %v437_v25 }
 0x2db   : > { %v801_v26 = vpop.f32.mrf.mxu1 }
 0x2dc   : > { %481 = vst.msk [vmem:[#allocation3] sm:$0xff] %vm480_vm2, %v476_v20  ;;  %v479_v28 = vadd.f32 %v801_v26, %v475_v23 }
 0x2dd   : > { %v447_v30 = vpop.f32.mrf.mxu1 }
 0x2de   : > { %484 = vst.msk [vmem:[#allocation3 + $0x18] sm:$0xff] %vm480_vm2, %v479_v28  ;;  %v478_v31 = vadd.f32 %v474_v29, %v447_v30 }
 0x2df   : > { %v579_v32 = vpop.f32.mrf.mxu1 }
 0x2e0   : > { %483 = vst.msk [vmem:[#allocation3 + $0x10] sm:$0xff] %vm480_vm2, %v478_v31  ;;  %922 = vlog2.f32 %v579_v32 }
 0x2e1   : > { %v812_v33 = vpop.f32.mrf.mxu1 }
 0x2ed   : > { %v923_v34 = vpop.eup %922 }
 0x2ee   : > { %v584_v35 = vmul.f32 0.6931472, %v923_v34  ;;  %591 = sbr.rel (%p758_p0) target bundleno = 778 (0x30a), region = 36 }
 0x2f0   : > { %v585_v36 = vadd.f32 %v584_v35, %v1217_v43 }
 0x2f2   : > { %587 = vst.msk [vmem:[%s1138_s24] sm:$0x1] %vm586_vm4, %v585_v36 }
 0x2f3   : > { %v596_v37 = vld [vmem:[#allocation3] sm:$0xff]  ;;  %v597_v38 = vld [vmem:[#allocation3 + $0x8] sm:$0xff]  ;;  %v598_v39 = vld [vmem:[#allocation3 + $0x10] sm:$0xff] }
 0x2f4   : > { %924 = vlog2.f32 %v596_v37  ;;  %v599_v40 = vld [vmem:[#allocation3 + $0x18] sm:$0xff]  ;;  %v592_v42 = vld [vmem:[#allocation2] sm:$0xff]  ;;  %v593_v43 = vld [vmem:[#allocation2 + $0x8] sm:$0xff] }
 0x2f5   : > { %926 = vlog2.f32 %v597_v38  ;;  %v594_v48 = vld [vmem:[#allocation2 + $0x10] sm:$0xff]  ;;  %v595_v52 = vld [vmem:[#allocation2 + $0x18] sm:$0xff] }
 0x2f6   : > { %928 = vlog2.f32 %v598_v39 }
 0x2f7   : > { %930 = vlog2.f32 %v599_v40 }
 0x301   : > { %v925_v41 = vpop.eup %924 }
 0x302   : > { %v927_v44 = vpop.eup %926  ;;  %v601_v45 = vmul.f32 0.6931472, %v925_v41 }
 0x303   : > { %v929_v46 = vpop.eup %928  ;;  %v603_v47 = vmul.f32 0.6931472, %v927_v44 }
 0x304   : > { %v931_v49 = vpop.eup %930  ;;  %v608_v50 = vadd.f32 %v601_v45, %v592_v42  ;;  %v605_v51 = vmul.f32 0.6931472, %v929_v46 }
 0x305   : > { %v609_v53 = vadd.f32 %v603_v47, %v593_v43  ;;  %v607_v54 = vmul.f32 0.6931472, %v931_v49 }
 0x306   : > { %612 = vst.msk [vmem:[%s1134_s21] sm:$0xff] %vm480_vm2, %v608_v50  ;;  %v610_v55 = vadd.f32 %v605_v51, %v594_v48 }
 0x307   : > { %613 = vst.msk [vmem:[%s1134_s21 + $0x8] sm:$0xff] %vm480_vm2, %v609_v53  ;;  %v611_v56 = vadd.f32 %v607_v54, %v595_v52 }
 0x308   : > { %614 = vst.msk [vmem:[%s1134_s21 + $0x10] sm:$0xff] %vm480_vm2, %v610_v55 }
 0x309   : > { %615 = vst.msk [vmem:[%s1134_s21 + $0x18] sm:$0xff] %vm480_vm2, %v611_v56 }
 0x30a PF: > { %s759_s8 = sshll.u32 %s1012_s16, 1  ;;  %s640_s10 = sshll.u32 %s1138_s24, 4  ;;  %s641_s10 = int_to_ptr.vmem [resolvable:$true] %s640_s10 }
 0x30b   : > { %s636_s9 = sadd.s32 %s1008_s15, %s759_s8  ;;  %s622_s29 = scalar_lea.sflag [#allocation5], %s184_s4 }
 0x30c   : > { %s760_s11 = sshll.u32 %s636_s9, 4  ;;  %s932_s5 = scalar_lea.vmem %s641_s10, 16 }
 0x30d   : > { %s638_s28 = scalar_lea.hbm %s1315_s3, %s760_s11  ;;  %p933_p1 = scmp.ne.s32.totalorder %s641_s10, %s932_s5 }
 0x30e   : > { %s1032_s21 = smov [#allocation4]  }
 0x30f   : > { %p934_p2 = pnand %p933_p1, %p1104_p3  ;;  %s936_s6 = sshll.u32 %s1032_s21, 4  ;;  %s937_s6 = int_to_ptr.vmem [resolvable:$false] %s936_s6 }
 0x310   : > { %s938_s7 = scalar_lea.vmem %s937_s6, 32  ;;  %p939_p5 = scmp.lt.s32.totalorder %s641_s10, %s937_s6 }
 0x311   : > { %p935_p4 = pneg %p934_p2  ;;  %p940_p6 = scmp.lt.s32.totalorder %s938_s7, %s932_s5 }
 0x313   : > { %p941_p7 = por %p940_p6, %p939_p5 }
 0x315   : > { %p942_p9 = pnand %p941_p7, %p935_p4 }
 0x317   : > { %945 = shalt.err (!%p942_p9)
}
 0x318   : > { %s946_s15 = scalar_lea.hbm %s638_s28, 16  ;;  %s950_s24 = scalar_lea.hbm %s1315_s3, 64 }
 0x319   : > { %p947_p10 = scmp.ne.s32.totalorder %s638_s28, %s946_s15  ;;  %p951_p13 = scmp.lt.s32.totalorder %s638_s28, %s1315_s3 }
 0x31a   : > { %p952_p0 = scmp.lt.s32.totalorder %s950_s24, %s946_s15 }
 0x31b   : > { %p948_p11 = pnand %p947_p10, %p1104_p3 }
 0x31c   : > { %p953_p1 = por %p952_p0, %p951_p13 }
 0x31d   : > { %p949_p12 = pneg %p948_p11 }
 0x31f   : > { %p954_p2 = pnand %p953_p1, %p949_p12 }
 0x321   : > { %957 = shalt.err (!%p954_p2)
}
 0x322   : > { %815 = dma.vmem_to_hbm [thread:$0]  (%p1104_p3), %s641_s10, 16, %s638_s28, %s622_s29  }
 0x323 PF: > { %p821_p4 = scmp.ge.s32.totalorder %s1024_s19, 2  ;;  %s660_s11 = sand.u32 1, %s996_s12  }
 0x324   : > { %s661_s20 = scalar_lea.sflag [#allocation5], %s660_s11 }
 0x325   : > { %p818_p5 = pnand %p821_p4, %p1113_p8 }
 0x327   : > { %p819_p6 = pneg %p818_p5 }
 0x329   : > { %991 = dma.done.wait (%p819_p6), %s661_s20, 16  }
 0x32a   : > { %993 = vsyncadd (%p819_p6), %s661_s20, 4294967280  ;;  %s17_s19 = sadd.s32 1, %s1024_s19   ;;  %s1318_s12 = smov %s1000_s13 }
 0x32b   : > { %p14_p7 = scmp.ge.s32.totalorder %s17_s19, 6   ;;  %s1319_s13 = smov %s1004_s14 }
 0x32c   : > { %s1320_s14 = smov %s1122_s30  ;;  %s1321_s15 = smov %s1016_s17 }
 0x32d   : > { %s1322_s16 = smov %s1020_s18  ;;  %s1323_s17 = smov %s1326_s22 }
 0x32e   : > { %s1324_s18 = smov %s1330_s23  ;;  %16 = sbr.rel (!%p14_p7) target bundleno = 5 (0x5), region = 84 }
 0x333   :  { %665 = vsyncpa [#allocation5], 1 }
 0x334   :  { %667 = vsyncpa [#allocation5 + $0x1], 1 }

</bundles_post_ra>
